<compile_context>
chip_gen: v7x
topology: tpu7x:2x2x1
jax: 0.10.0
libtpu: 0.0.40
codegen_flags: <defaults>
</compile_context>

<pallas_src>
import functools

import jax
import jax.numpy as jnp
from jax import lax
from jax.experimental import pallas as pl
from jax.experimental.pallas import tpu as pltpu

KH = KW = 4
STRIDE = 2
PAD = 1
BN_EPS = 0.8          # BatchNorm2d(out_size, 0.8) -> eps=0.8
LRELU_SLOPE = 0.2

RECOMPUTE_K_MAX = 256       # K <= this: skip conv_out round trip, recompute in pass 2
TK_MAX = 4096               # K tile when the reduction dim must be split
TM_TARGET = 4096            # row-tile target for matmul passes
TM_TARGET_ELEMWISE = 8192   # row-tile target for the pure-elementwise pass


def _round_up(x, m):
    return (x + m - 1) // m * m


def _cdiv(a, b):
    return (a + b - 1) // b


def _vmem_budget_bytes():
    cap = 64 * 1024 * 1024                      # conservative default (v7x-sized)
    try:
        cap = int(pltpu.get_tpu_info().vmem_capacity_bytes)
    except Exception:
        pass
    return max(32 * 1024 * 1024, (cap * 3) // 4)   # ~48 MiB v7x, ~96 MiB v5e/v6e


_VMEM_BUDGET = _vmem_budget_bytes()


def _choose_rows(m, per_row_bytes, fixed_bytes, target):
    """Largest row tile (multiple of 8) <= target fitting the VMEM budget; prefer
    >= 2 tiles so the 'parallel' M axis can shard across v7x's two TensorCores."""
    avail = max(_VMEM_BUDGET - fixed_bytes - (2 << 20), per_row_bytes * 8)
    tm = target
    while tm > 8 and per_row_bytes * tm > avail:
        tm //= 2
    if m >= 16:
        tm = min(tm, _round_up(_cdiv(m, 2), 8))
    else:
        tm = min(tm, _round_up(max(m, 1), 8))
    return max(tm, 8)


def _mask_rows(acc, tm, m_true):
    row = pl.program_id(0) * tm + lax.broadcasted_iota(jnp.int32, (acc.shape[0], 1), 0)
    return jnp.where(row < m_true, acc, 0.0)


# ----------------------------------------------------------------------------
# Small-K path (K <= RECOMPUTE_K_MAX): stats-only pass 1, fused conv+BN pass 2.
# ----------------------------------------------------------------------------
def _stats_kernel(p_ref, w_ref, stats_ref, *, tm, m_true, needs_mask):
    acc = jnp.dot(p_ref[...], w_ref[...], preferred_element_type=jnp.float32)
    if needs_mask:
        acc = _mask_rows(acc, tm, m_true)
    stats_ref[0:1, :] = jnp.sum(acc, axis=0, keepdims=True)
    stats_ref[1:2, :] = jnp.sum(acc * acc, axis=0, keepdims=True)


def _conv_bn_lrelu_kernel(p_ref, w_ref, scale_ref, shift_ref, o_ref):
    y = jnp.dot(p_ref[...], w_ref[...], preferred_element_type=jnp.float32)
    y = y * scale_ref[...] + shift_ref[...]
    o_ref[...] = jnp.where(y > 0.0, y, LRELU_SLOPE * y).astype(o_ref.dtype)


# ----------------------------------------------------------------------------
# Large-K path: K-tiled matmul + stats (bf16 intermediate), then BN+LReLU pass.
# ----------------------------------------------------------------------------
def _conv_stats_store_kernel(p_ref, w_ref, o_ref, stats_ref, acc_ref,
                             *, tm, m_true, needs_mask):
    k = pl.program_id(1)

    @pl.when(k == 0)
    def _():
        acc_ref[...] = jnp.zeros_like(acc_ref)

    acc_ref[...] += jnp.dot(p_ref[...], w_ref[...],
                            preferred_element_type=jnp.float32)

    @pl.when(k == pl.num_programs(1) - 1)
    def _():
        acc = acc_ref[...]
        o_ref[...] = acc.astype(o_ref.dtype)          # bf16 inter-pass intermediate
        if needs_mask:
            acc = _mask_rows(acc, tm, m_true)
        stats_ref[0:1, :] = jnp.sum(acc, axis=0, keepdims=True)
        stats_ref[1:2, :] = jnp.sum(acc * acc, axis=0, keepdims=True)


def _bn_lrelu_kernel(y_ref, scale_ref, shift_ref, o_ref):
    y = y_ref[...].astype(jnp.float32) * scale_ref[...] + shift_ref[...]
    o_ref[...] = jnp.where(y > 0.0, y, LRELU_SLOPE * y).astype(o_ref.dtype)


# ----------------------------------------------------------------------------
# Wrapper
# ----------------------------------------------------------------------------
@jax.jit
def unet_down(x, weight, gamma, beta):
    """x: [N, C_in, H, W]; weight: [C_out, C_in, 4, 4]; gamma/beta: [C_out].
    Returns [N, C_out, Ho, Wo] (NCHW), matching PyTorch UNetDown.forward."""
    n, c_in, h, w = x.shape
    c_out = weight.shape[0]
    ho = (h + 2 * PAD - KH) // STRIDE + 1
    wo = (w + 2 * PAD - KW) // STRIDE + 1
    k_dim = c_in * KH * KW
    m = n * ho * wo
    c_pad = _round_up(c_out, 128)

    # Fused patch extraction straight into NHWC (feature order (c_in, kh, kw),
    # matching weight.reshape(C_out, -1)); bf16 operands for the MXU.  No pad.
    patches = lax.conv_general_dilated_patches(
        x.astype(jnp.bfloat16), (KH, KW), (STRIDE, STRIDE),
        ((PAD, PAD), (PAD, PAD)),
        dimension_numbers=("NCHW", "OIHW", "NHWC")).reshape(m, k_dim)

    # weight [C_out, C_in, 4, 4] -> [K, C_pad] bf16, lane-dense padded C.
    w2 = weight.reshape(c_out, k_dim).T.astype(jnp.bfloat16)
    w2 = jnp.pad(w2, ((0, 0), (0, c_pad - c_out)))

    def _cparams(sem):
        return pltpu.CompilerParams(dimension_semantics=sem,
                                    vmem_limit_bytes=_VMEM_BUDGET)

    recompute = k_dim <= RECOMPUTE_K_MAX

    if recompute:
        tk = k_dim
        fixed = 2 * tk * c_pad * 2                       # double-buffered weight
        per_row = 4 * tk + 8 * c_pad                     # bf16 patches x2 + f32 out x2
        tm = _choose_rows(m, per_row, fixed, TM_TARGET)
        nmt = _cdiv(m, tm)
        needs_mask = (m % tm) != 0

        stats = pl.pallas_call(
            functools.partial(_stats_kernel, tm=tm, m_true=m, needs_mask=needs_mask),
            out_shape=jax.ShapeDtypeStruct((nmt, 2, c_pad), jnp.float32),
            grid_spec=pltpu.PrefetchScalarGridSpec(
                num_scalar_prefetch=0,
                grid=(nmt,),
                in_specs=[pl.BlockSpec((tm, tk), lambda i: (i, 0)),
                          pl.BlockSpec((tk, c_pad), lambda i: (0, 0))],
                out_specs=pl.BlockSpec((None, 2, c_pad), lambda i: (i, 0, 0))),
            compiler_params=_cparams(("parallel",)),
        )(patches, w2)
        conv_out = None
    else:
        if k_dim <= TK_MAX:
            tk = k_dim
        else:
            tk = k_dim                                   # fallback: whole K resident
            for cand in range(TK_MAX, 127, -128):
                if k_dim % cand == 0:
                    tk = cand
                    break
        nkt = _cdiv(k_dim, tk)
        fixed = 2 * tk * c_pad * 2
        per_row = 4 * tk + 4 * c_pad + 4 * c_pad         # patches x2, f32 acc, bf16 out x2
        tm = _choose_rows(m, per_row, fixed, TM_TARGET)
        nmt = _cdiv(m, tm)
        needs_mask = (m % tm) != 0

        conv_out, stats = pl.pallas_call(
            functools.partial(_conv_stats_store_kernel, tm=tm, m_true=m,
                              needs_mask=needs_mask),
            out_shape=(jax.ShapeDtypeStruct((m, c_pad), jnp.bfloat16),
                       jax.ShapeDtypeStruct((nmt, 2, c_pad), jnp.float32)),
            grid_spec=pltpu.PrefetchScalarGridSpec(
                num_scalar_prefetch=0,
                grid=(nmt, nkt),
                in_specs=[pl.BlockSpec((tm, tk), lambda i, k: (i, k)),
                          pl.BlockSpec((tk, c_pad), lambda i, k: (k, 0))],
                out_specs=(pl.BlockSpec((tm, c_pad), lambda i, k: (i, 0)),
                           pl.BlockSpec((None, 2, c_pad), lambda i, k: (i, 0, 0))),
                scratch_shapes=[pltpu.VMEM((tm, c_pad), jnp.float32)]),
            compiler_params=_cparams(("parallel", "arbitrary")),
        )(patches, w2)

    # Exact batch statistics (biased var, eps=0.8) folded once into scale/shift.
    tot = jnp.sum(stats, axis=0)                         # [2, C_pad]
    mean = tot[0] / m
    var = jnp.maximum(tot[1] / m - mean * mean, 0.0)
    g = jnp.pad(gamma.astype(jnp.float32), (0, c_pad - c_out))
    b = jnp.pad(beta.astype(jnp.float32), (0, c_pad - c_out))
    inv = lax.rsqrt(var + BN_EPS)
    scale = (g * inv).reshape(1, c_pad)
    shift = (b - mean * g * inv).reshape(1, c_pad)

    if recompute:
        out = pl.pallas_call(
            _conv_bn_lrelu_kernel,
            out_shape=jax.ShapeDtypeStruct((m, c_pad), jnp.float32),
            grid_spec=pltpu.PrefetchScalarGridSpec(
                num_scalar_prefetch=0,
                grid=(nmt,),
                in_specs=[pl.BlockSpec((tm, tk), lambda i: (i, 0)),
                          pl.BlockSpec((tk, c_pad), lambda i: (0, 0)),
                          pl.BlockSpec((1, c_pad), lambda i: (0, 0)),
                          pl.BlockSpec((1, c_pad), lambda i: (0, 0))],
                out_specs=pl.BlockSpec((tm, c_pad), lambda i: (i, 0))),
            compiler_params=_cparams(("parallel",)),
        )(patches, w2, scale, shift)
    else:
        tm2 = _choose_rows(m, 12 * c_pad, 0, TM_TARGET_ELEMWISE)
        nmt2 = _cdiv(m, tm2)
        out = pl.pallas_call(
            _bn_lrelu_kernel,
            out_shape=jax.ShapeDtypeStruct((m, c_pad), jnp.float32),
            grid_spec=pltpu.PrefetchScalarGridSpec(
                num_scalar_prefetch=0,
                grid=(nmt2,),
                in_specs=[pl.BlockSpec((tm2, c_pad), lambda i: (i, 0)),
                          pl.BlockSpec((1, c_pad), lambda i: (0, 0)),
                          pl.BlockSpec((1, c_pad), lambda i: (0, 0))],
                out_specs=pl.BlockSpec((tm2, c_pad), lambda i: (i, 0))),
            compiler_params=_cparams(("parallel",)),
        )(conv_out, scale, shift)

    out = out[:, :c_out].reshape(n, ho, wo, c_out)
    return out.transpose(0, 3, 1, 2)   # NHWC -> NCHW (PyTorch layout)


def unet_down_reference(x, weight, gamma, beta):
    """Pure-JAX reference mirroring PyTorch semantics (inputs cast to bf16 to
    match the kernel's MXU operand precision; accumulation in f32)."""
    y = lax.conv_general_dilated(
        x.astype(jnp.bfloat16), weight.astype(jnp.bfloat16),
        window_strides=(STRIDE, STRIDE), padding=((PAD, PAD), (PAD, PAD)),
        dimension_numbers=("NCHW", "OIHW", "NCHW"),
        preferred_element_type=jnp.float32)
    mean = jnp.mean(y, axis=(0, 2, 3), keepdims=True)
    var = jnp.mean((y - mean) ** 2, axis=(0, 2, 3), keepdims=True)
    yhat = (y - mean) * lax.rsqrt(var + BN_EPS)
    yhat = yhat * gamma.reshape(1, -1, 1, 1) + beta.reshape(1, -1, 1, 1)
    return jnp.where(yhat > 0, yhat, LRELU_SLOPE * yhat)


if __name__ == "__main__":
    # Small shapes consistent with UNetDown(in_size=4, out_size=8)
    N, C_IN, H, W = 2, 4, 16, 16
    C_OUT = 8

    key = jax.random.PRNGKey(0)
    kx, kw, kg, kb = jax.random.split(key, 4)
    x = jax.random.normal(kx, (N, C_IN, H, W), dtype=jnp.float32)
    weight = 0.1 * jax.random.normal(kw, (C_OUT, C_IN, KH, KW), dtype=jnp.float32)
    gamma = 1.0 + 0.1 * jax.random.normal(kg, (C_OUT,), dtype=jnp.float32)
    beta = 0.1 * jax.random.normal(kb, (C_OUT,), dtype=jnp.float32)

    out = jax.block_until_ready(unet_down(x, weight, gamma, beta))
    ref = jax.block_until_ready(unet_down_reference(x, weight, gamma, beta))

    assert out.shape == (N, C_OUT, H // 2, W // 2), out.shape
    assert jnp.allclose(out, ref, atol=1e-3, rtol=1e-3), float(
        jnp.max(jnp.abs(out - ref)))
    print("KERNEL_OK")
</pallas_src>

<mosaic_0001>
module attributes {stable_mosaic.version = 11 : i64} {
  func.func @_stats_kernel(%arg0: i32, %arg1: memref<64x64xbf16, #tpu.memory_space<vmem>>, %arg2: memref<64x128xbf16, #tpu.memory_space<vmem>>, %arg3: memref<1x2x128xf32, #tpu.memory_space<vmem>>) attributes {dimension_semantics = [#tpu.dimension_semantics<parallel>], iteration_bounds = array<i64: 2>, scalar_prefetch = 0 : i64, scratch_operands = 0 : i64, tpu.core_type = #tpu.core_type<tc>, window_params = [{transform_indices = @transform_0, window_bounds = array<i64: 64, 64>}, {pipeline_mode = #tpu.pipeline_mode<synchronous>, transform_indices = @transform_1, window_bounds = array<i64: 64, 128>}, {transform_indices = @transform_2, window_bounds = array<i64: 1, 2, 128>}]} {
    %c0 = arith.constant 0 : index
    %c0_0 = arith.constant 0 : index
    %0 = vector.load %arg1[%c0, %c0_0] : memref<64x64xbf16, #tpu.memory_space<vmem>>, vector<64x64xbf16>
    %c0_1 = arith.constant 0 : index
    %c0_2 = arith.constant 0 : index
    %1 = vector.load %arg2[%c0_1, %c0_2] : memref<64x128xbf16, #tpu.memory_space<vmem>>, vector<64x128xbf16>
    %cst = arith.constant dense<0.000000e+00> : vector<64x128xf32>
    %2 = tpu.matmul %0, %1, %cst {dimension_numbers = #tpu.dot_dimension_numbers<[1], [0], [0], [1], [0, 0, 1, 1], [], []>} : vector<64x64xbf16>, vector<64x128xbf16>, vector<64x128xf32> -> vector<64x128xf32>
    %cst_3 = arith.constant dense<0.000000e+00> : vector<128xf32>
    %3 = vector.multi_reduction <add>, %2, %cst_3 [0] : vector<64x128xf32> to vector<128xf32>
    %4 = vector.shape_cast %3 : vector<128xf32> to vector<1x128xf32>
    %c0_4 = arith.constant 0 : index
    %c0_5 = arith.constant 0 : index
    %c0_6 = arith.constant 0 : index
    %5 = vector.load %arg3[%c0_4, %c0_5, %c0_6] : memref<1x2x128xf32, #tpu.memory_space<vmem>>, vector<1x1x128xf32>
    %6 = vector.shape_cast %5 : vector<1x1x128xf32> to vector<1x128xf32>
    %7 = vector.shape_cast %4 : vector<1x128xf32> to vector<1x1x128xf32>
    tpu.vector_store %arg3[%c0_4, %c0_5, %c0_6], %7 {strides = array<i32>} : memref<1x2x128xf32, #tpu.memory_space<vmem>>, vector<1x1x128xf32>,
    %8 = arith.mulf %2, %2 : vector<64x128xf32>
    %cst_7 = arith.constant dense<0.000000e+00> : vector<128xf32>
    %9 = vector.multi_reduction <add>, %8, %cst_7 [0] : vector<64x128xf32> to vector<128xf32>
    %10 = vector.shape_cast %9 : vector<128xf32> to vector<1x128xf32>
    %c0_8 = arith.constant 0 : index
    %c1 = arith.constant 1 : index
    %c0_9 = arith.constant 0 : index
    %11 = vector.load %arg3[%c0_8, %c1, %c0_9] : memref<1x2x128xf32, #tpu.memory_space<vmem>>, vector<1x1x128xf32>
    %12 = vector.shape_cast %11 : vector<1x1x128xf32> to vector<1x128xf32>
    %13 = vector.shape_cast %10 : vector<1x128xf32> to vector<1x1x128xf32>
    tpu.vector_store %arg3[%c0_8, %c1, %c0_9], %13 {strides = array<i32>} : memref<1x2x128xf32, #tpu.memory_space<vmem>>, vector<1x1x128xf32>,
    return
  }
  func.func @transform_0(%arg0: i32) -> (i32, i32) {
    %c0_i32 = arith.constant 0 : i32
    %c0_i32_0 = arith.constant 0 : i32
    return %arg0, %c0_i32 : i32, i32
  }
  func.func @transform_1(%arg0: i32) -> (i32, i32) {
    %c0_i32 = arith.constant 0 : i32
    %c0_i32_0 = arith.constant 0 : i32
    %c0_i32_1 = arith.constant 0 : i32
    return %c0_i32, %c0_i32_0 : i32, i32
  }
  func.func @transform_2(%arg0: i32) -> (i32, i32, i32) {
    %c0_i32 = arith.constant 0 : i32
    %c0_i32_0 = arith.constant 0 : i32
    %c0_i32_1 = arith.constant 0 : i32
    return %arg0, %c0_i32, %c0_i32_0 : i32, i32, i32
  }
}

module attributes {stable_mosaic.version = 11 : i64} {
  func.func @_conv_bn_lrelu_kernel(%arg0: i32, %arg1: memref<64x64xbf16, #tpu.memory_space<vmem>>, %arg2: memref<64x128xbf16, #tpu.memory_space<vmem>>, %arg3: memref<1x128xf32, #tpu.memory_space<vmem>>, %arg4: memref<1x128xf32, #tpu.memory_space<vmem>>, %arg5: memref<64x128xf32, #tpu.memory_space<vmem>>) attributes {dimension_semantics = [#tpu.dimension_semantics<parallel>], iteration_bounds = array<i64: 2>, scalar_prefetch = 0 : i64, scratch_operands = 0 : i64, tpu.core_type = #tpu.core_type<tc>, window_params = [{transform_indices = @transform_0, window_bounds = array<i64: 64, 64>}, {pipeline_mode = #tpu.pipeline_mode<synchronous>, transform_indices = @transform_1, window_bounds = array<i64: 64, 128>}, {pipeline_mode = #tpu.pipeline_mode<synchronous>, transform_indices = @transform_2, window_bounds = array<i64: 1, 128>}, {pipeline_mode = #tpu.pipeline_mode<synchronous>, transform_indices = @transform_3, window_bounds = array<i64: 1, 128>}, {transform_indices = @transform_4, window_bounds = array<i64: 64, 128>}]} {
    %c0 = arith.constant 0 : index
    %c0_0 = arith.constant 0 : index
    %0 = vector.load %arg1[%c0, %c0_0] : memref<64x64xbf16, #tpu.memory_space<vmem>>, vector<64x64xbf16>
    %c0_1 = arith.constant 0 : index
    %c0_2 = arith.constant 0 : index
    %1 = vector.load %arg2[%c0_1, %c0_2] : memref<64x128xbf16, #tpu.memory_space<vmem>>, vector<64x128xbf16>
    %cst = arith.constant dense<0.000000e+00> : vector<64x128xf32>
    %2 = tpu.matmul %0, %1, %cst {dimension_numbers = #tpu.dot_dimension_numbers<[1], [0], [0], [1], [0, 0, 1, 1], [], []>} : vector<64x64xbf16>, vector<64x128xbf16>, vector<64x128xf32> -> vector<64x128xf32>
    %c0_3 = arith.constant 0 : index
    %c0_4 = arith.constant 0 : index
    %3 = vector.load %arg3[%c0_3, %c0_4] : memref<1x128xf32, #tpu.memory_space<vmem>>, vector<1x128xf32>
    %4 = vector.broadcast %3 : vector<1x128xf32> to vector<64x128xf32>
    %5 = arith.mulf %2, %4 : vector<64x128xf32>
    %c0_5 = arith.constant 0 : index
    %c0_6 = arith.constant 0 : index
    %6 = vector.load %arg4[%c0_5, %c0_6] : memref<1x128xf32, #tpu.memory_space<vmem>>, vector<1x128xf32>
    %7 = vector.broadcast %6 : vector<1x128xf32> to vector<64x128xf32>
    %8 = arith.addf %5, %7 : vector<64x128xf32>
    %cst_7 = arith.constant 0.000000e+00 : f32
    %9 = vector.broadcast %cst_7 : f32 to vector<64x128xf32>
    %10 = arith.cmpf ogt, %8, %9 : vector<64x128xf32>
    %cst_8 = arith.constant 2.000000e-01 : f32
    %11 = vector.broadcast %cst_8 : f32 to vector<64x128xf32>
    %12 = arith.mulf %11, %8 : vector<64x128xf32>
    %13 = arith.select %10, %8, %12 : vector<64x128xi1>, vector<64x128xf32>
    %c0_9 = arith.constant 0 : index
    %c0_10 = arith.constant 0 : index
    %14 = vector.load %arg5[%c0_9, %c0_10] : memref<64x128xf32, #tpu.memory_space<vmem>>, vector<64x128xf32>
    tpu.vector_store %arg5[%c0_9, %c0_10], %13 {strides = array<i32>} : memref<64x128xf32, #tpu.memory_space<vmem>>, vector<64x128xf32>,
    return
  }
  func.func @transform_0(%arg0: i32) -> (i32, i32) {
    %c0_i32 = arith.constant 0 : i32
    %c0_i32_0 = arith.constant 0 : i32
    return %arg0, %c0_i32 : i32, i32
  }
  func.func @transform_1(%arg0: i32) -> (i32, i32) {
    %c0_i32 = arith.constant 0 : i32
    %c0_i32_0 = arith.constant 0 : i32
    %c0_i32_1 = arith.constant 0 : i32
    return %c0_i32, %c0_i32_0 : i32, i32
  }
  func.func @transform_2(%arg0: i32) -> (i32, i32) {
    %c0_i32 = arith.constant 0 : i32
    %c0_i32_0 = arith.constant 0 : i32
    %c0_i32_1 = arith.constant 0 : i32
    return %c0_i32, %c0_i32_0 : i32, i32
  }
  func.func @transform_3(%arg0: i32) -> (i32, i32) {
    %c0_i32 = arith.constant 0 : i32
    %c0_i32_0 = arith.constant 0 : i32
    %c0_i32_1 = arith.constant 0 : i32
    return %c0_i32, %c0_i32_0 : i32, i32
  }
  func.func @transform_4(%arg0: i32) -> (i32, i32) {
    %c0_i32 = arith.constant 0 : i32
    %c0_i32_0 = arith.constant 0 : i32
    return %arg0, %c0_i32 : i32, i32
  }
}

</mosaic_0001>

<bundles_post_ra>
// kernel: unet_down.2
= control target key start
LH: loop header
LB: loop body
LE: loop exit
PB: predicated region body
PF: predicated region fallthrough
CT: control target
= control target key end

     0   :  { %s465_s9 = smov 0   ;;  %s503_s0 = inlined_call_operand.vmem [shape: bf16[128,64], index: 0, kind: input, shape index: {}]   ;;  %s504_s1 = inlined_call_operand.vmem [shape: bf16[64,128], index: 1, kind: input, shape index: {}]   ;;  %s505_s2 = inlined_call_operand.vmem [shape: f32[2,2,128], index: 2, kind: output, shape index: {}]  }
   0x1 LB: > { %s471_s10 = sadd.s32 4294967295, %s448_s9   ;;  %p376_p0 = scmp.ge.s32.totalorder %s448_s9, 1  ;;  %s448_s9 = sphi %s465_s9, %s12_s9  }
   0x2   : > { %p113_p1 = scmp.lt.s32.totalorder %s448_s9, 3 }
   0x4   : > { %p114_p2 = pnand %p376_p0, %p113_p1 }
   0x5   : > { %v434_v0 = vld [vmem:[%s504_s1] sm:$0xff] (!%p114_p2)   ;;  %s377_s13 = sshll.u32 (!%p114_p2), %s471_s10, 3  ;;  %v435_v1 = vld [vmem:[%s504_s1 + $0x8] sm:$0xff] (!%p114_p2)   ;;  %v436_v2 = vld [vmem:[%s504_s1 + $0x10] sm:$0xff] (!%p114_p2)   ;;  %vm205_vm0 = vcmask (!%p114_p2), 523264   ;;  %p140_p4 = scmp.lt.s32.totalorder (!%p114_p2), %s471_s10, 1 }
   0x6   : > { %117 = sbr.rel (%p114_p2) target bundleno = 266 (0x10a), region = 28  ;;  %p135_p3 = scmp.lt.s32.totalorder (!%p114_p2), %s377_s13, 15  ;;  %402 = vmatprep.subr.bf16.mxu0 (!%p114_p2), %v434_v0  ;;  %418 = vmatprep.subr.bf16.mxu1 (!%p114_p2), %v434_v0  ;;  %v437_v4 = vld [vmem:[%s504_s1 + $0x18] sm:$0xff] (!%p114_p2)  }
   0x7   : > { %403 = vmatpush3.bf16.msra.mxu0 (!%p114_p2), %v434_v0  ;;  %422 = vmatpush3.bf16.msra.mxu1 (!%p114_p2), %v434_v0 }
   0x8   : > { %404 = vmatprep.subr.bf16.mxu0 (!%p114_p2), %v435_v1  ;;  %419 = vmatprep.subr.bf16.mxu1 (!%p114_p2), %v435_v1 }
   0xb   : > { %405 = vmatpush3.bf16.msra.mxu0 (!%p114_p2), %v435_v1  ;;  %423 = vmatpush3.bf16.msra.mxu1 (!%p114_p2), %v435_v1 }
   0xc   : > { %406 = vmatprep.subr.bf16.mxu0 (!%p114_p2), %v436_v2  ;;  %420 = vmatprep.subr.bf16.mxu1 (!%p114_p2), %v436_v2 }
   0xd   : > { %s507_s13 = smov (!%p135_p3, %s377_s13), 15  ;;  %s509_s10 = smov (!%p140_p4, %s471_s10), 1 }
   0xe   : > { %s378_s18 = sshll.u32 %s507_s13, 2  ;;  %s379_s24 = sshll.u32 %s509_s10, 1 }
   0xf   : > { %s138_s21 = scalar_lea.vmem %s503_s0, %s378_s18  ;;  %407 = vmatpush3.bf16.msra.mxu0 %v436_v2  ;;  %424 = vmatpush3.bf16.msra.mxu1 %v436_v2  ;;  %s143_s27 = scalar_lea.vmem %s505_s2, %s379_s24 }
  0x10   : > { %v438_v3 = vld [vmem:[%s138_s21] sm:$0xff]   ;;  %v440_v5 = vld [vmem:[%s138_s21 + $0x10] sm:$0xff]   ;;  %408 = vmatprep.subr.bf16.mxu0 %v437_v4  ;;  %421 = vmatprep.subr.bf16.mxu1 %v437_v4  ;;  %v439_v6 = vld [vmem:[%s138_s21 + $0x8] sm:$0xff]  }
  0x11   : > { %410 = vmatprep.mubr.msk.bf16.mxu0 %vm205_vm0, %v438_v3  ;;  %414 = vmatprep.mubr.msk.bf16.mxu1 %vm205_vm0, %v440_v5  ;;  %v441_v7 = vld [vmem:[%s138_s21 + $0x18] sm:$0xff]  }
  0x13   : > { %409 = vmatpush3.bf16.msra.mxu0 %v437_v4  ;;  %425 = vmatpush3.bf16.msra.mxu1 %v437_v4 }
  0x16   : > { %411 = vmatmul.mubr.msk.bf16.vlgmr.msra.gmra.mrb[0].mxu0 %vm205_vm0, %v439_v6  ;;  %415 = vmatmul.mubr.msk.bf16.vlgmr.msra.gmra.mrb[0].mxu1 %vm205_vm0, %v441_v7 }
  0xe9   : > { %v412_v8 = vpop.f32.mrb[0].mxu0  ;;  %v416_v9 = vpop.f32.mrb[0].mxu1 }
  0xea   : > { %v252_v10 = vpop.f32.mrb[1].mxu0  ;;  %v268_v11 = vpop.f32.mrb[1].mxu1  ;;  %v299_v19 = vmul.f32 %v412_v8, %v412_v8  ;;  %v303_v31 = vmul.f32 %v416_v9, %v416_v9 }
  0xeb   : > { %v413_v12 = vpop.f32.mrb[2].mxu0  ;;  %v417_v13 = vpop.f32.mrb[2].mxu1  ;;  %v297_v16 = vmul.f32 %v252_v10, %v252_v10  ;;  %v301_v25 = vmul.f32 %v268_v11, %v268_v11 }
  0xec   : > { %v255_v14 = vpop.f32.mrb[3].mxu0  ;;  %v271_v15 = vpop.f32.mrb[3].mxu1  ;;  %v300_v22 = vmul.f32 %v413_v12, %v413_v12  ;;  %v304_v34 = vmul.f32 %v417_v13, %v417_v13 }
  0xed   : > { %v283_v17 = vadd.f32 %v255_v14, %v252_v10  ;;  %v298_v18 = vmul.f32 %v255_v14, %v255_v14  ;;  %v302_v30 = vmul.f32 %v271_v15, %v271_v15 }
  0xef   : > { %v284_v20 = vadd.f32 %v412_v8, %v283_v17  ;;  %v305_v21 = vadd.f32 %v298_v18, %v297_v16 }
  0xf1   : > { %v306_v23 = vadd.f32 %v305_v21, %v299_v19  ;;  %v285_v24 = vadd.f32 %v413_v12, %v284_v20 }
  0xf3   : > { %v286_v26 = vadd.f32 %v285_v24, %v268_v11  ;;  %v307_v27 = vadd.f32 %v306_v23, %v300_v22 }
  0xf5   : > { %v308_v28 = vadd.f32 %v307_v27, %v301_v25  ;;  %v287_v29 = vadd.f32 %v286_v26, %v271_v15 }
  0xf7   : > { %v288_v32 = vadd.f32 %v416_v9, %v287_v29  ;;  %v309_v33 = vadd.f32 %v308_v28, %v302_v30 }
  0xf9   : > { %v289_v35 = vadd.f32 %v417_v13, %v288_v32  ;;  %v310_v36 = vadd.f32 %v309_v33, %v303_v31 }
  0xfb   : > { %v290_v37 = vrot.slane %v289_v35, 4  ;;  %v311_v38 = vadd.f32 %v310_v36, %v304_v34 }
  0xfd   : > { %v291_v39 = vadd.f32 %v290_v37, %v289_v35  ;;  %v312_v40 = vrot.slane %v311_v38, 4 }
  0xff   : > { %v292_v41 = vrot.slane %v291_v39, 2  ;;  %v313_v42 = vadd.f32 %v312_v40, %v311_v38 }
 0x101   : > { %v293_v43 = vadd.f32 %v292_v41, %v291_v39  ;;  %v314_v44 = vrot.slane %v313_v42, 2 }
 0x103   : > { %v294_v45 = vrot.slane %v293_v43, 1  ;;  %v315_v46 = vadd.f32 %v314_v44, %v313_v42 }
 0x105   : > { %v295_v47 = vadd.f32 %v294_v45, %v293_v43  ;;  %v316_v48 = vrot.slane %v315_v46, 1 }
 0x107   : > { %296 = vst [vmem:[%s143_s27] sm:$0x1] %v295_v47  ;;  %v317_v49 = vadd.f32 %v316_v48, %v315_v46 }
 0x109   : > { %318 = vst [vmem:[%s143_s27 + $0x1] sm:$0x1] %v317_v49 }
 0x10a PF: > { %s12_s9 = sadd.s32 1, %s448_s9  }
 0x10b   : > { %p9_p5 = scmp.ge.s32.totalorder %s12_s9, 4  }
 0x10d   :  { %11 = sbr.rel (!%p9_p5) target bundleno = 1 (0x1), region = 58 }

// kernel: unet_down.3
= control target key start
LH: loop header
LB: loop body
LE: loop exit
PB: predicated region body
PF: predicated region fallthrough
CT: control target
= control target key end

     0   :  { %s564_s15 = smov 0   ;;  %s617_s0 = inlined_call_operand.vmem [shape: bf16[128,64], index: 0, kind: input, shape index: {}]   ;;  %s618_s1 = inlined_call_operand.vmem [shape: bf16[64,128], index: 1, kind: input, shape index: {}]   ;;  %s619_s2 = inlined_call_operand.vmem [shape: f32[1,128], index: 2, kind: input, shape index: {}]   ;;  %s620_s3 = inlined_call_operand.vmem [shape: f32[1,128], index: 3, kind: input, shape index: {}]   ;;  %s621_s4 = inlined_call_operand.vmem [shape: f32[128,128], index: 4, kind: output, shape index: {}]  }
   0x1 LB: > { %s458_s16 = sadd.s32 4294967295, %s537_s15   ;;  %p462_p0 = scmp.ge.s32.totalorder %s537_s15, 1  ;;  %s537_s15 = sphi %s564_s15, %s14_s15  }
   0x2   : > { %p163_p1 = scmp.lt.s32.totalorder %s537_s15, 3 }
   0x4   : > { %p164_p2 = pnand %p462_p0, %p163_p1 }
   0x5   : > { %v523_v0 = vld [vmem:[%s618_s1] sm:$0xff] (!%p164_p2)   ;;  %s463_s19 = sshll.u32 (!%p164_p2), %s458_s16, 3  ;;  %v524_v1 = vld [vmem:[%s618_s1 + $0x8] sm:$0xff] (!%p164_p2)   ;;  %v525_v2 = vld [vmem:[%s618_s1 + $0x10] sm:$0xff] (!%p164_p2)   ;;  %vm262_vm0 = vcmask (!%p164_p2), 523264  }
   0x6   : > { %167 = sbr.rel (%p164_p2) target bundleno = 248 (0xf8), region = 36  ;;  %p190_p3 = scmp.lt.s32.totalorder (!%p164_p2), %s463_s19, 15  ;;  %491 = vmatprep.subr.bf16.mxu0 (!%p164_p2), %v523_v0  ;;  %507 = vmatprep.subr.bf16.mxu1 (!%p164_p2), %v523_v0  ;;  %v526_v3 = vld [vmem:[%s618_s1 + $0x18] sm:$0xff] (!%p164_p2)   ;;  %v479_v8 = vld [vmem:[%s619_s2] ss:$0 sm:$0xff] (!%p164_p2) }
   0x7   : > { %492 = vmatpush3.bf16.msra.mxu0 (!%p164_p2), %v523_v0  ;;  %511 = vmatpush3.bf16.msra.mxu1 (!%p164_p2), %v523_v0  ;;  %v480_v10 = vld [vmem:[%s620_s3] ss:$0 sm:$0xff] (!%p164_p2) }
   0x8   : > { %493 = vmatprep.subr.bf16.mxu0 (!%p164_p2), %v524_v1  ;;  %508 = vmatprep.subr.bf16.mxu1 (!%p164_p2), %v524_v1 }
   0xb   : > { %494 = vmatpush3.bf16.msra.mxu0 (!%p164_p2), %v524_v1  ;;  %512 = vmatpush3.bf16.msra.mxu1 (!%p164_p2), %v524_v1 }
   0xc   : > { %495 = vmatprep.subr.bf16.mxu0 (!%p164_p2), %v525_v2  ;;  %509 = vmatprep.subr.bf16.mxu1 (!%p164_p2), %v525_v2 }
   0xd   : > { %s623_s19 = smov (!%p190_p3, %s463_s19), 15 }
   0xe   : > { %s464_s24 = sshll.u32 %s623_s19, 2  ;;  %s466_s8 = sshll.u32 %s623_s19, 3 }
   0xf   : > { %s193_s29 = scalar_lea.vmem %s617_s0, %s464_s24  ;;  %496 = vmatpush3.bf16.msra.mxu0 %v525_v2  ;;  %513 = vmatpush3.bf16.msra.mxu1 %v525_v2  ;;  %s604_s11 = scalar_lea.vmem %s621_s4, %s466_s8 }
  0x10   : > { %v527_v4 = vld [vmem:[%s193_s29] sm:$0xff]   ;;  %v528_v5 = vld [vmem:[%s193_s29 + $0x10] sm:$0xff]   ;;  %497 = vmatprep.subr.bf16.mxu0 %v526_v3  ;;  %510 = vmatprep.subr.bf16.mxu1 %v526_v3  ;;  %v529_v6 = vld [vmem:[%s193_s29 + $0x8] sm:$0xff]  }
  0x11   : > { %499 = vmatprep.mubr.msk.bf16.mxu0 %vm262_vm0, %v527_v4  ;;  %503 = vmatprep.mubr.msk.bf16.mxu1 %vm262_vm0, %v528_v5  ;;  %v530_v7 = vld [vmem:[%s193_s29 + $0x18] sm:$0xff]  }
  0x13   : > { %498 = vmatpush3.bf16.msra.mxu0 %v526_v3  ;;  %514 = vmatpush3.bf16.msra.mxu1 %v526_v3 }
  0x16   : > { %500 = vmatmul.mubr.msk.bf16.vlgmr.msra.gmra.mrb[0].mxu0 %vm262_vm0, %v529_v6  ;;  %504 = vmatmul.mubr.msk.bf16.vlgmr.msra.gmra.mrb[0].mxu1 %vm262_vm0, %v530_v7 }
  0xe9   : > { %v501_v9 = vpop.f32.mrb[0].mxu0  ;;  %v505_v11 = vpop.f32.mrb[0].mxu1 }
  0xea   : > { %v349_v12 = vmul.f32 %v501_v9, %v479_v8  ;;  %v353_v13 = vmul.f32 %v505_v11, %v479_v8  ;;  %v309_v14 = vpop.f32.mrb[1].mxu0  ;;  %v325_v15 = vpop.f32.mrb[1].mxu1 }
  0xeb   : > { %v347_v16 = vmul.f32 %v479_v8, %v309_v14  ;;  %v351_v17 = vmul.f32 %v479_v8, %v325_v15  ;;  %v502_v18 = vpop.f32.mrb[2].mxu0  ;;  %v506_v19 = vpop.f32.mrb[2].mxu1 }
  0xec   : > { %v364_v20 = vadd.f32 %v480_v10, %v349_v12  ;;  %v368_v21 = vadd.f32 %v480_v10, %v353_v13  ;;  %v350_v22 = vmul.f32 %v502_v18, %v479_v8  ;;  %v354_v23 = vmul.f32 %v506_v19, %v479_v8  ;;  %v312_v24 = vpop.f32.mrb[3].mxu0  ;;  %v328_v25 = vpop.f32.mrb[3].mxu1 }
  0xed   : > { %v362_v26 = vadd.f32 %v480_v10, %v347_v16  ;;  %v366_v27 = vadd.f32 %v480_v10, %v351_v17  ;;  %v348_v28 = vmul.f32 %v479_v8, %v312_v24  ;;  %v352_v29 = vmul.f32 %v479_v8, %v328_v25 }
  0xee   : > { %vm372_vm1 = vcmp.gt.f32.partialorder %v364_v20, 0.0  ;;  %v380_v30 = vmul.f32 0.2, %v364_v20  ;;  %vm376_vm2 = vcmp.gt.f32.partialorder %v368_v21, 0.0  ;;  %v384_v31 = vmul.f32 0.2, %v368_v21 }
  0xef   : > { %vm370_vm3 = vcmp.gt.f32.partialorder %v362_v26, 0.0  ;;  %v378_v32 = vmul.f32 0.2, %v362_v26  ;;  %vm374_vm4 = vcmp.gt.f32.partialorder %v366_v27, 0.0  ;;  %v382_v33 = vmul.f32 0.2, %v366_v27 }
  0xf0   : > { %v388_v34 = vsel %vm372_vm1, %v364_v20, %v380_v30  ;;  %v392_v35 = vsel %vm376_vm2, %v368_v21, %v384_v31  ;;  %v365_v36 = vadd.f32 %v480_v10, %v350_v22  ;;  %v369_v37 = vadd.f32 %v480_v10, %v354_v23 }
  0xf1   : > { %396 = vst [vmem:[%s604_s11 + $0x10] sm:$0xff] %v388_v34  ;;  %400 = vst [vmem:[%s604_s11 + $0x30] sm:$0xff] %v392_v35  ;;  %v386_v38 = vsel %vm370_vm3, %v362_v26, %v378_v32  ;;  %v390_v39 = vsel %vm374_vm4, %v366_v27, %v382_v33  ;;  %v363_v40 = vadd.f32 %v480_v10, %v348_v28 }
  0xf2   : > { %v367_v41 = vadd.f32 %v480_v10, %v352_v29  ;;  %394 = vst [vmem:[%s604_s11] sm:$0xff] %v386_v38  ;;  %398 = vst [vmem:[%s604_s11 + $0x20] sm:$0xff] %v390_v39  ;;  %vm373_vm5 = vcmp.gt.f32.partialorder %v365_v36, 0.0  ;;  %v381_v42 = vmul.f32 0.2, %v365_v36  ;;  %vm377_vm6 = vcmp.gt.f32.partialorder %v369_v37, 0.0 }
  0xf3   : > { %v385_v43 = vmul.f32 0.2, %v369_v37  ;;  %vm371_vm7 = vcmp.gt.f32.partialorder %v363_v40, 0.0  ;;  %v379_v44 = vmul.f32 0.2, %v363_v40 }
  0xf4   : > { %vm375_vm8 = vcmp.gt.f32.partialorder %v367_v41, 0.0  ;;  %v383_v45 = vmul.f32 0.2, %v367_v41  ;;  %v389_v46 = vsel %vm373_vm5, %v365_v36, %v381_v42 }
  0xf5   : > { %v393_v47 = vsel %vm377_vm6, %v369_v37, %v385_v43  ;;  %397 = vst [vmem:[%s604_s11 + $0x18] sm:$0xff] %v389_v46  ;;  %v387_v48 = vsel %vm371_vm7, %v363_v40, %v379_v44 }
  0xf6   : > { %401 = vst [vmem:[%s604_s11 + $0x38] sm:$0xff] %v393_v47  ;;  %v391_v49 = vsel %vm375_vm8, %v367_v41, %v383_v45  ;;  %395 = vst [vmem:[%s604_s11 + $0x8] sm:$0xff] %v387_v48 }
  0xf7   : > { %399 = vst [vmem:[%s604_s11 + $0x28] sm:$0xff] %v391_v49 }
  0xf8 PF: > { %s14_s15 = sadd.s32 1, %s537_s15  }
  0xf9   : > { %p11_p4 = scmp.ge.s32.totalorder %s14_s15, 4  }
  0xfb   :  { %13 = sbr.rel (!%p11_p4) target bundleno = 1 (0x1), region = 66 }

</bundles_post_ra>
